<compile_context>
chip_gen: v7x
topology: tpu7x:2x2x1
jax: 0.10.0
libtpu: 0.0.40
codegen_flags: <defaults>
</compile_context>

<pallas_src>
import jax
import jax.numpy as jnp
from jax.experimental import pallas as pl
from jax.experimental.pallas import tpu as pltpu

C_IN = 3
C_MID = 16
C_OUT = 3
TILE_R_MAX = 512          # rows of 128 pixels per grid step (64K pixels)


def _round_up(x, m):
    return (x + m - 1) // m * m


def _choose_tile_r(r, n):
    """Pixel-row tile: multiple of 8 (or the full extent); >=2 steps if n==1."""
    steps = (r + TILE_R_MAX - 1) // TILE_R_MAX
    if n == 1 and r >= 16:          # keep both v7x TensorCores busy
        steps = max(steps, 2)
    if steps <= 1:
        return r
    tile_r = (r + steps - 1) // steps
    tile_r = _round_up(tile_r, 8)   # sublane-aligned blocks
    return r if tile_r >= r else tile_r


def _fused_kernel(params_ref, x_ref, o_ref):
    # params_ref : SMEM f32[24] = [w1_3 (3x3) | b1_3 (3) | w_eff (3x3) | b_eff (3)]
    # x_ref      : VMEM (C_IN , TILE_R, 128)  pixel-dense slab per channel
    # o_ref      : VMEM (C_OUT, TILE_R, 128)
    x0 = x_ref[0]
    x1 = x_ref[1]
    x2 = x_ref[2]
    for o in range(C_OUT):
        # v1_o = conv1x1_{3->16}(x)[o]  (only the 3 channels the output needs)
        v1 = (params_ref[9 + o]
              + params_ref[3 * o + 0] * x0
              + params_ref[3 * o + 1] * x1
              + params_ref[3 * o + 2] * x2)
        # v3_o = SiLU(v1_o); exp lands on the EUP slot, divide is exact
        v3 = v1 * (1.0 / (1.0 + jnp.exp(-v1)))
        # v4_o = (pointwise_conv ∘ conv)(x)[o] via the pre-fused 3x3 weights
        v4 = (params_ref[21 + o]
              + params_ref[12 + 3 * o + 0] * x0
              + params_ref[12 + 3 * o + 1] * x1
              + params_ref[12 + 3 * o + 2] * x2)
        v5 = jnp.clip(v4, 0.0, 256.0)
        # TODO(synk): PyTorch's `v6 = v3 * v5` is a 16-vs-3 channel mismatch
        # (not broadcastable, raises at runtime); we use v3's first 3 channels.
        o_ref[o] = v3 * v5


def fused_forward(x_nchw, w1, b1, w2t, b2):
    """x_nchw: (N, 3, H, W) float32 -> (N, 3, H, W) float32."""
    n, c, h, w = x_nchw.shape
    assert c == C_IN
    p = h * w

    # Algebraic conv-conv fusion (exact up to fp32 reassociation).
    w_eff = w2t.T @ w1                          # (3, 3)
    b_eff = (w2t.T @ b1 + b2).reshape(-1)       # (3,)
    params = jnp.concatenate([
        w1[:C_OUT].reshape(-1),                 # 9
        b1[:C_OUT].reshape(-1),                 # 3
        w_eff.reshape(-1),                      # 9
        b_eff,                                  # 3
    ]).astype(jnp.float32)                      # (24,)

    r = (p + 127) // 128
    tile_r = _choose_tile_r(r, n)
    r_pad = _round_up(r, tile_r)
    p_pad = r_pad * 128

    x3 = x_nchw.reshape(n, C_IN, p)             # free: NCHW is channel-major
    if p_pad != p:
        # Only when H*W is misaligned; zero pad keeps exp finite, tail sliced off.
        x3 = jnp.pad(x3, ((0, 0), (0, 0), (0, p_pad - p)))
    x4 = x3.reshape(n, C_IN, r_pad, 128)        # pixel-dense slabs (free reshape)

    grid = (n, r_pad // tile_r)
    out = pl.pallas_call(
        _fused_kernel,
        out_shape=jax.ShapeDtypeStruct((n, C_OUT, r_pad, 128), jnp.float32),
        grid_spec=pltpu.PrefetchScalarGridSpec(
            num_scalar_prefetch=0,
            grid=grid,
            in_specs=[
                # ~24 weight/bias scalars live in SMEM
                pl.BlockSpec(memory_space=pltpu.MemorySpace.SMEM),
                # batch dim squeezed; dense (tile_r, 128) pixel slabs per channel
                pl.BlockSpec((None, C_IN, tile_r, 128), lambda i, j: (i, 0, j, 0)),
            ],
            out_specs=pl.BlockSpec((None, C_OUT, tile_r, 128),
                                   lambda i, j: (i, 0, j, 0)),
        ),
        compiler_params=pltpu.CompilerParams(
            dimension_semantics=("parallel", "parallel"),
            vmem_limit_bytes=32 * 1024 * 1024),
    )(params, x4)

    out = out.reshape(n, C_OUT, p_pad)
    if p_pad != p:
        out = out[:, :, :p]
    return out.reshape(n, C_OUT, h, w)


def init_params(key):
    """Deterministic Conv2d-style (uniform) init for the two 1x1 convs."""
    k1, k2, k3, k4 = jax.random.split(key, 4)
    # conv: Conv2d(3, 16, 1) -> weight (16,3), bias (16,1); bound = 1/sqrt(fan_in)
    bound1 = 1.0 / (C_IN ** 0.5)
    w1 = jax.random.uniform(k1, (C_MID, C_IN), jnp.float32, -bound1, bound1)
    b1 = jax.random.uniform(k2, (C_MID, 1), jnp.float32, -bound1, bound1)
    # pointwise_conv: Conv2d(16, 3, 1) -> weight stored transposed (16,3), bias (3,1)
    bound2 = 1.0 / (C_MID ** 0.5)
    w2t = jax.random.uniform(k3, (C_MID, C_OUT), jnp.float32, -bound2, bound2)
    b2 = jax.random.uniform(k4, (C_OUT, 1), jnp.float32, -bound2, bound2)
    return w1, b1, w2t, b2


def reference_forward(x_nchw, w1, b1, w2t, b2):
    """Pure-JAX reference of the same (repaired) computation, un-fused."""
    n, c, h, w = x_nchw.shape
    x = x_nchw.reshape(n, C_IN, h * w)                       # (N, 3, P)
    v1 = jnp.einsum("mc,ncp->nmp", w1, x) + b1[None]         # (N, 16, P)
    v3 = v1 * jax.nn.sigmoid(v1)
    v4 = jnp.einsum("mo,nmp->nop", w2t, v1) + b2[None]       # (N, 3, P)
    v5 = jnp.clip(v4, 0.0, 256.0)
    v6 = v3[:, :C_OUT] * v5
    return v6.reshape(n, C_OUT, h, w)


if __name__ == "__main__":
    key = jax.random.PRNGKey(0)
    kx, kp = jax.random.split(key)

    # small shapes consistent with the module: batch=2, C=3, spatial=16
    x = jax.random.normal(kx, (2, 3, 16, 16), dtype=jnp.float32)
    w1, b1, w2t, b2 = init_params(kp)

    out = fused_forward(x, w1, b1, w2t, b2)
    out = jax.block_until_ready(out)

    ref = reference_forward(x, w1, b1, w2t, b2)
    assert out.shape == (2, 3, 16, 16)
    assert jnp.allclose(out, ref, atol=1e-4, rtol=1e-4)

    print("KERNEL_OK")
</pallas_src>

<mosaic_0001>
module attributes {stable_mosaic.version = 11 : i64} {
  func.func @_fused_kernel(%arg0: i32, %arg1: i32, %arg2: memref<24xf32, #tpu.memory_space<smem>>, %arg3: memref<1x3x2x128xf32, #tpu.memory_space<vmem>>, %arg4: memref<1x3x2x128xf32, #tpu.memory_space<vmem>>) attributes {dimension_semantics = [#tpu.dimension_semantics<parallel>, #tpu.dimension_semantics<parallel>], iteration_bounds = array<i64: 2, 1>, scalar_prefetch = 0 : i64, scratch_operands = 0 : i64, tpu.core_type = #tpu.core_type<tc>, window_params = [{transform_indices = @transform_0, window_bounds = array<i64: 24>}, {transform_indices = @transform_1, window_bounds = array<i64: 1, 3, 2, 128>}, {transform_indices = @transform_2, window_bounds = array<i64: 1, 3, 2, 128>}]} {
    %c0 = arith.constant 0 : index
    %c0_0 = arith.constant 0 : index
    %c0_1 = arith.constant 0 : index
    %c0_2 = arith.constant 0 : index
    %0 = vector.load %arg3[%c0, %c0_0, %c0_1, %c0_2] : memref<1x3x2x128xf32, #tpu.memory_space<vmem>>, vector<1x1x2x128xf32>
    %1 = vector.shape_cast %0 : vector<1x1x2x128xf32> to vector<2x128xf32>
    %c0_3 = arith.constant 0 : index
    %c1 = arith.constant 1 : index
    %c0_4 = arith.constant 0 : index
    %c0_5 = arith.constant 0 : index
    %2 = vector.load %arg3[%c0_3, %c1, %c0_4, %c0_5] : memref<1x3x2x128xf32, #tpu.memory_space<vmem>>, vector<1x1x2x128xf32>
    %3 = vector.shape_cast %2 : vector<1x1x2x128xf32> to vector<2x128xf32>
    %c0_6 = arith.constant 0 : index
    %c2 = arith.constant 2 : index
    %c0_7 = arith.constant 0 : index
    %c0_8 = arith.constant 0 : index
    %4 = vector.load %arg3[%c0_6, %c2, %c0_7, %c0_8] : memref<1x3x2x128xf32, #tpu.memory_space<vmem>>, vector<1x1x2x128xf32>
    %5 = vector.shape_cast %4 : vector<1x1x2x128xf32> to vector<2x128xf32>
    %c9 = arith.constant 9 : index
    %6 = memref.load %arg2[%c9] : memref<24xf32, #tpu.memory_space<smem>>
    %c0_9 = arith.constant 0 : index
    %7 = memref.load %arg2[%c0_9] : memref<24xf32, #tpu.memory_space<smem>>
    %8 = vector.broadcast %7 : f32 to vector<2x128xf32>
    %9 = arith.mulf %8, %1 : vector<2x128xf32>
    %10 = vector.broadcast %6 : f32 to vector<2x128xf32>
    %11 = arith.addf %10, %9 : vector<2x128xf32>
    %c1_10 = arith.constant 1 : index
    %12 = memref.load %arg2[%c1_10] : memref<24xf32, #tpu.memory_space<smem>>
    %13 = vector.broadcast %12 : f32 to vector<2x128xf32>
    %14 = arith.mulf %13, %3 : vector<2x128xf32>
    %15 = arith.addf %11, %14 : vector<2x128xf32>
    %c2_11 = arith.constant 2 : index
    %16 = memref.load %arg2[%c2_11] : memref<24xf32, #tpu.memory_space<smem>>
    %17 = vector.broadcast %16 : f32 to vector<2x128xf32>
    %18 = arith.mulf %17, %5 : vector<2x128xf32>
    %19 = arith.addf %15, %18 : vector<2x128xf32>
    %cst = arith.constant 0.000000e+00 : f32
    %20 = vector.broadcast %cst : f32 to vector<2x128xf32>
    %21 = arith.subf %20, %19 : vector<2x128xf32>
    %22 = math.exp %21 : vector<2x128xf32>
    %cst_12 = arith.constant 1.000000e+00 : f32
    %23 = vector.broadcast %cst_12 : f32 to vector<2x128xf32>
    %24 = arith.addf %23, %22 : vector<2x128xf32>
    %cst_13 = arith.constant 1.000000e+00 : f32
    %25 = vector.broadcast %cst_13 : f32 to vector<2x128xf32>
    %26 = arith.divf %25, %24 : vector<2x128xf32>
    %27 = arith.mulf %19, %26 : vector<2x128xf32>
    %c21 = arith.constant 21 : index
    %28 = memref.load %arg2[%c21] : memref<24xf32, #tpu.memory_space<smem>>
    %c12 = arith.constant 12 : index
    %29 = memref.load %arg2[%c12] : memref<24xf32, #tpu.memory_space<smem>>
    %30 = vector.broadcast %29 : f32 to vector<2x128xf32>
    %31 = arith.mulf %30, %1 : vector<2x128xf32>
    %32 = vector.broadcast %28 : f32 to vector<2x128xf32>
    %33 = arith.addf %32, %31 : vector<2x128xf32>
    %c13 = arith.constant 13 : index
    %34 = memref.load %arg2[%c13] : memref<24xf32, #tpu.memory_space<smem>>
    %35 = vector.broadcast %34 : f32 to vector<2x128xf32>
    %36 = arith.mulf %35, %3 : vector<2x128xf32>
    %37 = arith.addf %33, %36 : vector<2x128xf32>
    %c14 = arith.constant 14 : index
    %38 = memref.load %arg2[%c14] : memref<24xf32, #tpu.memory_space<smem>>
    %39 = vector.broadcast %38 : f32 to vector<2x128xf32>
    %40 = arith.mulf %39, %5 : vector<2x128xf32>
    %41 = arith.addf %37, %40 : vector<2x128xf32>
    %cst_14 = arith.constant 0.000000e+00 : f32
    %cst_15 = arith.constant 2.560000e+02 : f32
    %42 = vector.broadcast %cst_14 : f32 to vector<2x128xf32>
    %43 = arith.maximumf %42, %41 : vector<2x128xf32>
    %44 = vector.broadcast %cst_15 : f32 to vector<2x128xf32>
    %45 = arith.minimumf %44, %43 : vector<2x128xf32>
    %46 = arith.mulf %27, %45 : vector<2x128xf32>
    %c0_16 = arith.constant 0 : index
    %c0_17 = arith.constant 0 : index
    %c0_18 = arith.constant 0 : index
    %c0_19 = arith.constant 0 : index
    %47 = vector.load %arg4[%c0_16, %c0_17, %c0_18, %c0_19] : memref<1x3x2x128xf32, #tpu.memory_space<vmem>>, vector<1x1x2x128xf32>
    %48 = vector.shape_cast %47 : vector<1x1x2x128xf32> to vector<2x128xf32>
    %49 = vector.shape_cast %46 : vector<2x128xf32> to vector<1x1x2x128xf32>
    tpu.vector_store %arg4[%c0_16, %c0_17, %c0_18, %c0_19], %49 {strides = array<i32>} : memref<1x3x2x128xf32, #tpu.memory_space<vmem>>, vector<1x1x2x128xf32>,
    %c10 = arith.constant 10 : index
    %50 = memref.load %arg2[%c10] : memref<24xf32, #tpu.memory_space<smem>>
    %c3 = arith.constant 3 : index
    %51 = memref.load %arg2[%c3] : memref<24xf32, #tpu.memory_space<smem>>
    %52 = vector.broadcast %51 : f32 to vector<2x128xf32>
    %53 = arith.mulf %52, %1 : vector<2x128xf32>
    %54 = vector.broadcast %50 : f32 to vector<2x128xf32>
    %55 = arith.addf %54, %53 : vector<2x128xf32>
    %c4 = arith.constant 4 : index
    %56 = memref.load %arg2[%c4] : memref<24xf32, #tpu.memory_space<smem>>
    %57 = vector.broadcast %56 : f32 to vector<2x128xf32>
    %58 = arith.mulf %57, %3 : vector<2x128xf32>
    %59 = arith.addf %55, %58 : vector<2x128xf32>
    %c5 = arith.constant 5 : index
    %60 = memref.load %arg2[%c5] : memref<24xf32, #tpu.memory_space<smem>>
    %61 = vector.broadcast %60 : f32 to vector<2x128xf32>
    %62 = arith.mulf %61, %5 : vector<2x128xf32>
    %63 = arith.addf %59, %62 : vector<2x128xf32>
    %cst_20 = arith.constant 0.000000e+00 : f32
    %64 = vector.broadcast %cst_20 : f32 to vector<2x128xf32>
    %65 = arith.subf %64, %63 : vector<2x128xf32>
    %66 = math.exp %65 : vector<2x128xf32>
    %cst_21 = arith.constant 1.000000e+00 : f32
    %67 = vector.broadcast %cst_21 : f32 to vector<2x128xf32>
    %68 = arith.addf %67, %66 : vector<2x128xf32>
    %cst_22 = arith.constant 1.000000e+00 : f32
    %69 = vector.broadcast %cst_22 : f32 to vector<2x128xf32>
    %70 = arith.divf %69, %68 : vector<2x128xf32>
    %71 = arith.mulf %63, %70 : vector<2x128xf32>
    %c22 = arith.constant 22 : index
    %72 = memref.load %arg2[%c22] : memref<24xf32, #tpu.memory_space<smem>>
    %c15 = arith.constant 15 : index
    %73 = memref.load %arg2[%c15] : memref<24xf32, #tpu.memory_space<smem>>
    %74 = vector.broadcast %73 : f32 to vector<2x128xf32>
    %75 = arith.mulf %74, %1 : vector<2x128xf32>
    %76 = vector.broadcast %72 : f32 to vector<2x128xf32>
    %77 = arith.addf %76, %75 : vector<2x128xf32>
    %c16 = arith.constant 16 : index
    %78 = memref.load %arg2[%c16] : memref<24xf32, #tpu.memory_space<smem>>
    %79 = vector.broadcast %78 : f32 to vector<2x128xf32>
    %80 = arith.mulf %79, %3 : vector<2x128xf32>
    %81 = arith.addf %77, %80 : vector<2x128xf32>
    %c17 = arith.constant 17 : index
    %82 = memref.load %arg2[%c17] : memref<24xf32, #tpu.memory_space<smem>>
    %83 = vector.broadcast %82 : f32 to vector<2x128xf32>
    %84 = arith.mulf %83, %5 : vector<2x128xf32>
    %85 = arith.addf %81, %84 : vector<2x128xf32>
    %cst_23 = arith.constant 0.000000e+00 : f32
    %cst_24 = arith.constant 2.560000e+02 : f32
    %86 = vector.broadcast %cst_23 : f32 to vector<2x128xf32>
    %87 = arith.maximumf %86, %85 : vector<2x128xf32>
    %88 = vector.broadcast %cst_24 : f32 to vector<2x128xf32>
    %89 = arith.minimumf %88, %87 : vector<2x128xf32>
    %90 = arith.mulf %71, %89 : vector<2x128xf32>
    %c0_25 = arith.constant 0 : index
    %c1_26 = arith.constant 1 : index
    %c0_27 = arith.constant 0 : index
    %c0_28 = arith.constant 0 : index
    %91 = vector.load %arg4[%c0_25, %c1_26, %c0_27, %c0_28] : memref<1x3x2x128xf32, #tpu.memory_space<vmem>>, vector<1x1x2x128xf32>
    %92 = vector.shape_cast %91 : vector<1x1x2x128xf32> to vector<2x128xf32>
    %93 = vector.shape_cast %90 : vector<2x128xf32> to vector<1x1x2x128xf32>
    tpu.vector_store %arg4[%c0_25, %c1_26, %c0_27, %c0_28], %93 {strides = array<i32>} : memref<1x3x2x128xf32, #tpu.memory_space<vmem>>, vector<1x1x2x128xf32>,
    %c11 = arith.constant 11 : index
    %94 = memref.load %arg2[%c11] : memref<24xf32, #tpu.memory_space<smem>>
    %c6 = arith.constant 6 : index
    %95 = memref.load %arg2[%c6] : memref<24xf32, #tpu.memory_space<smem>>
    %96 = vector.broadcast %95 : f32 to vector<2x128xf32>
    %97 = arith.mulf %96, %1 : vector<2x128xf32>
    %98 = vector.broadcast %94 : f32 to vector<2x128xf32>
    %99 = arith.addf %98, %97 : vector<2x128xf32>
    %c7 = arith.constant 7 : index
    %100 = memref.load %arg2[%c7] : memref<24xf32, #tpu.memory_space<smem>>
    %101 = vector.broadcast %100 : f32 to vector<2x128xf32>
    %102 = arith.mulf %101, %3 : vector<2x128xf32>
    %103 = arith.addf %99, %102 : vector<2x128xf32>
    %c8 = arith.constant 8 : index
    %104 = memref.load %arg2[%c8] : memref<24xf32, #tpu.memory_space<smem>>
    %105 = vector.broadcast %104 : f32 to vector<2x128xf32>
    %106 = arith.mulf %105, %5 : vector<2x128xf32>
    %107 = arith.addf %103, %106 : vector<2x128xf32>
    %cst_29 = arith.constant 0.000000e+00 : f32
    %108 = vector.broadcast %cst_29 : f32 to vector<2x128xf32>
    %109 = arith.subf %108, %107 : vector<2x128xf32>
    %110 = math.exp %109 : vector<2x128xf32>
    %cst_30 = arith.constant 1.000000e+00 : f32
    %111 = vector.broadcast %cst_30 : f32 to vector<2x128xf32>
    %112 = arith.addf %111, %110 : vector<2x128xf32>
    %cst_31 = arith.constant 1.000000e+00 : f32
    %113 = vector.broadcast %cst_31 : f32 to vector<2x128xf32>
    %114 = arith.divf %113, %112 : vector<2x128xf32>
    %115 = arith.mulf %107, %114 : vector<2x128xf32>
    %c23 = arith.constant 23 : index
    %116 = memref.load %arg2[%c23] : memref<24xf32, #tpu.memory_space<smem>>
    %c18 = arith.constant 18 : index
    %117 = memref.load %arg2[%c18] : memref<24xf32, #tpu.memory_space<smem>>
    %118 = vector.broadcast %117 : f32 to vector<2x128xf32>
    %119 = arith.mulf %118, %1 : vector<2x128xf32>
    %120 = vector.broadcast %116 : f32 to vector<2x128xf32>
    %121 = arith.addf %120, %119 : vector<2x128xf32>
    %c19 = arith.constant 19 : index
    %122 = memref.load %arg2[%c19] : memref<24xf32, #tpu.memory_space<smem>>
    %123 = vector.broadcast %122 : f32 to vector<2x128xf32>
    %124 = arith.mulf %123, %3 : vector<2x128xf32>
    %125 = arith.addf %121, %124 : vector<2x128xf32>
    %c20 = arith.constant 20 : index
    %126 = memref.load %arg2[%c20] : memref<24xf32, #tpu.memory_space<smem>>
    %127 = vector.broadcast %126 : f32 to vector<2x128xf32>
    %128 = arith.mulf %127, %5 : vector<2x128xf32>
    %129 = arith.addf %125, %128 : vector<2x128xf32>
    %cst_32 = arith.constant 0.000000e+00 : f32
    %cst_33 = arith.constant 2.560000e+02 : f32
    %130 = vector.broadcast %cst_32 : f32 to vector<2x128xf32>
    %131 = arith.maximumf %130, %129 : vector<2x128xf32>
    %132 = vector.broadcast %cst_33 : f32 to vector<2x128xf32>
    %133 = arith.minimumf %132, %131 : vector<2x128xf32>
    %134 = arith.mulf %115, %133 : vector<2x128xf32>
    %c0_34 = arith.constant 0 : index
    %c2_35 = arith.constant 2 : index
    %c0_36 = arith.constant 0 : index
    %c0_37 = arith.constant 0 : index
    %135 = vector.load %arg4[%c0_34, %c2_35, %c0_36, %c0_37] : memref<1x3x2x128xf32, #tpu.memory_space<vmem>>, vector<1x1x2x128xf32>
    %136 = vector.shape_cast %135 : vector<1x1x2x128xf32> to vector<2x128xf32>
    %137 = vector.shape_cast %134 : vector<2x128xf32> to vector<1x1x2x128xf32>
    tpu.vector_store %arg4[%c0_34, %c2_35, %c0_36, %c0_37], %137 {strides = array<i32>} : memref<1x3x2x128xf32, #tpu.memory_space<vmem>>, vector<1x1x2x128xf32>,
    return
  }
  func.func @transform_0(%arg0: i32, %arg1: i32) -> i32 {
    %c0_i32 = arith.constant 0 : i32
    %c0_i32_0 = arith.constant 0 : i32
    return %c0_i32 : i32
  }
  func.func @transform_1(%arg0: i32, %arg1: i32) -> (i32, i32, i32, i32) {
    %c0_i32 = arith.constant 0 : i32
    %c0_i32_0 = arith.constant 0 : i32
    %c0_i32_1 = arith.constant 0 : i32
    return %arg0, %c0_i32, %arg1, %c0_i32_0 : i32, i32, i32, i32
  }
  func.func @transform_2(%arg0: i32, %arg1: i32) -> (i32, i32, i32, i32) {
    %c0_i32 = arith.constant 0 : i32
    %c0_i32_0 = arith.constant 0 : i32
    %c0_i32_1 = arith.constant 0 : i32
    return %arg0, %c0_i32, %arg1, %c0_i32_0 : i32, i32, i32, i32
  }
}

</mosaic_0001>

<bundles_post_ra>
// kernel: tpu_custom_call.1
= control target key start
LH: loop header
LB: loop body
LE: loop exit
PB: predicated region body
PF: predicated region fallthrough
CT: control target
= control target key end

     0   :  { %7 = vsyncpa [#allocation5], 0  ;;  %s975_s0 = inlined_call_operand.hbm [shape: f32[24], index: 0, kind: input, shape index: {}]   ;;  %s976_s1 = inlined_call_operand.hbm [shape: f32[2,3,2,128], index: 1, kind: input, shape index: {}]   ;;  %s977_s2 = inlined_call_operand.hbm [shape: f32[2,3,2,128], index: 2, kind: output, shape index: {}]  }
   0x1   :  { %8 = vsyncpa [#allocation3], 0 }
   0x2   :  { %10 = vsyncpa [#allocation3 + $0x1], 0 }
   0x3   :  { %11 = vsyncpa [#allocation4], 0 }
   0x4   :  { %13 = vsyncpa [#allocation4 + $0x1], 0  ;;  %s711_s9 = smov 0   ;;  %s713_s10 = smov 0  }
   0x5   :  { %s715_s11 = smov 0   ;;  %s717_s12 = smov 0  }
   0x6   :  { %s719_s13 = smov 0   ;;  %s721_s14 = smov 0  }
   0x7 LB: > { %s427_s15 = sadd.s32 4294967295, %s687_s14   ;;  %s428_s16 = sadd.s32 4294967294, %s687_s14   ;;  %s687_s14 = sphi %s721_s14, %s19_s14   ;;  %s683_s13 = sphi %s719_s13, %s997_s13   ;;  %s679_s12 = sphi %s717_s12, %s996_s12   ;;  %s675_s11 = sphi %s715_s11, %s995_s11   ;;  %s671_s10 = sphi %s713_s10, %s994_s10   ;;  %s667_s9 = sphi %s711_s9, %s993_s9  }
   0x8   : > { %s61_s17 = sadd.s32 1, %s675_s11  ;;  %p68_p0 = scmp.ne.s32.totalorder %s675_s11, %s671_s10 }
   0x9   : > { %p69_p1 = scmp.eq.s32.totalorder %s687_s14, 0  ;;  %p74_p2 = scmp.ne.s32.totalorder %s671_s10, %s667_s9 }
   0xa   : > { %p749_p3 = scmp.eq.s32.totalorder %s427_s15, 0  ;;  %p100_p4 = scmp.eq.s32.totalorder %s427_s15, 1 }
   0xb   : > { %p70_p5 = por %p69_p1, %p68_p0  ;;  %p106_p6 = scmp.eq.s32.totalorder %s428_s16, 1 }
   0xc   : > { %s982_s18 = scalar_select %p749_p3, 1, 0 }
   0xd   : > { %p755_p7 = por %p749_p3, %p74_p2  ;;  %p759_p8 = por %p100_p4, %p68_p0 }
   0xe   : > { %p763_p9 = por %p106_p6, %p74_p2  ;;  %p429_p10 = scmp.ge.s32.totalorder %s687_s14, 1 }
   0xf   : > { %s983_s19 = scalar_select %p755_p7, 1, 0 }
  0x10   : > { %s984_s20 = scalar_select %p759_p8, 1, 0 }
  0x11   : > { %s985_s21 = scalar_select %p763_p9, 1, 0 }
  0x12   : > { %p113_p11 = scmp.lt.s32.totalorder %s687_s14, 3  ;;  %p490_p1 = scmp.lt.s32.totalorder %s687_s14, 2 }
  0x13   : > { %s135_s23 = sand.u32 1, %s675_s11   ;;  %s31_s25 = sadd.s32 1, %s683_s13 }
  0x14   : > { %p770_p13 = pnand %p429_p10, %p113_p11  ;;  %p778_p0 = pnand %p490_p1, %p70_p5 }
  0x15   : > { %s465_s26 = smul.u32 6, %s135_s23  ;;  %p33_p4 = scmp.ge.s32.totalorder %s31_s25, 2 }
  0x16   : > { %p477_p7 = pneg %p770_p13  ;;  %s558_s29 = scalar_lea.hbm %s975_s0, 16 }
  0x17   : > { %p559_p6 = scmp.ne.s32.totalorder %s975_s0, %s558_s29  ;;  %p565_p5 = scmp.lt.u32.totalorder %s558_s29, %s975_s0 }
  0x18   : > { %p478_p2 = pnand %p477_p7, %p749_p3 }
  0x1a   : > { %p560_p10 = pneg %p478_p2 }
  0x1c   : > { %p561_p11 = pnand %p560_p10, %p559_p6 }
  0x1e   : > { %p562_p12 = pneg %p561_p11 }
  0x20   : > { %p567_p1 = pnand %p565_p5, %p562_p12 }
  0x22   : > { %570 = shalt.err (!%p567_p1)
}
  0x23   : > { %s689_s6 = smov [#allocation2]   ;;  %s999_s25 = smov (%p33_p4, %s31_s25), 0 }
  0x24   : > { %480 = dma.hbm_to_smem (!%p478_p2), %s975_s0, 16, %s689_s6, [#allocation5]  }
  0x25   : > { %s466_s15 = smul.u32 96, %s683_s13  ;;  %s56_s16 = ssub.s32 %s683_s13, %s999_s25 }
  0x26   : > { %s139_s27 = scalar_lea.vmem [#allocation6], %s465_s26  ;;  %p59_p7 = scmp.eq.s32.totalorder %s56_s16, 0 }
  0x27   : > { %s147_s28 = sshll.u32 %s139_s27, 4  ;;  %s805_s3 = scalar_lea.hbm %s976_s1, %s466_s15  ;;  %s807_s28 = int_to_ptr.vmem [resolvable:$true] %s147_s28 }
  0x28   : > { %s812_s4 = scalar_select %p59_p7, %s675_s11, %s61_s17  }
  0x29   : > { %s814_s5 = scalar_lea.sflag [#allocation3], %s135_s23  ;;  %s571_s6 = scalar_lea.hbm %s805_s3, 96 }
  0x2a   : > { %p572_p12 = scmp.ne.s32.totalorder %s805_s3, %s571_s6  ;;  %p573_p2 = pneg %p778_p0 }
  0x2b   : > { %s576_s8 = scalar_lea.hbm %s976_s1, 192  ;;  %p577_p10 = scmp.lt.u32.totalorder %s805_s3, %s976_s1 }
  0x2c   : > { %p574_p4 = pnand %p573_p2, %p572_p12  ;;  %p578_p11 = scmp.lt.u32.totalorder %s576_s8, %s571_s6 }
  0x2d   : > { %p580_p1 = scmp.lt.u32.totalorder %s571_s6, %s805_s3 }
  0x2e   : > { %p575_p6 = pneg %p574_p4  ;;  %p579_p5 = por %p578_p11, %p577_p10 }
  0x30   : > { %p581_p7 = por %p580_p1, %p579_p5 }
  0x32   : > { %p582_p9 = pnand %p581_p7, %p575_p6 }
  0x34   : > { %585 = shalt.err (!%p582_p9)
}
  0x35   : > { %s586_s17 = scalar_lea.vmem %s807_s28, 96  ;;  %s690_s23 = smov [#allocation6]  }
  0x36   : > { %p587_p12 = scmp.ne.s32.totalorder %s807_s28, %s586_s17  ;;  %s591_s27 = sshll.u32 %s690_s23, 4  ;;  %s592_s27 = int_to_ptr.vmem [resolvable:$false] %s591_s27 }
  0x37   : > { %s593_s29 = scalar_lea.vmem %s592_s27, 192  ;;  %p594_p3 = scmp.lt.s32.totalorder %s807_s28, %s592_s27 }
  0x38   : > { %p589_p4 = pnand %p587_p12, %p573_p2  ;;  %p595_p10 = scmp.lt.s32.totalorder %s593_s29, %s586_s17 }
  0x3a   : > { %p590_p8 = pneg %p589_p4  ;;  %p596_p11 = por %p595_p10, %p594_p3 }
  0x3c   : > { %p597_p5 = pnand %p596_p11, %p590_p8 }
  0x3e   : > { %600 = shalt.err (!%p597_p5)
}
  0x3f   : > { %s691_s30 = smov 32   ;;  %s692_s6 = smov 2  }
  0x40   : > { %484 = dma.hbm_to_vmem [thread:$0]  (!%p778_p0), %s805_s3, 96, %s807_s28, %s814_s5, %s691_s30, %s691_s30, %s692_s6  }
  0x41   : > { %159 = sbr.rel (%p770_p13) target bundleno = 147 (0x93), region = 28  ;;  %p988_p9 = scmp.ne.s32.totalorder (!%p770_p13), %s982_s18, 0 }
  0x48   : > { %654 = dma.done.wait (%p988_p9), [#allocation5], 16  }
  0x49   : > { %656 = vsyncadd (%p988_p9), [#allocation5], 4294967280  ;;  %s849_s26 = sand.u32 1, %s671_s10   ;;  %p989_p3 = scmp.ne.s32.totalorder %s983_s19, 0 }
  0x4a   : > { %s467_s7 = smul.u32 6, %s849_s26  ;;  %s166_s8 = scalar_lea.sflag [#allocation3], %s849_s26 }
  0x4c   : > { %s169_s24 = scalar_lea.vmem [#allocation6], %s467_s7 }
  0x4d   : > { %658 = dma.done.wait (%p989_p3), %s166_s8, 96  }
  0x4e   : > { %660 = vsyncadd (%p989_p3), %s166_s8, 4294967200 }
  0x4f   : > { %174 = sfence }
  0x50   : > { %s437_s22 = sld [smem:[#allocation2 + $0x9]]  ;;  %s197_s18 = sld [smem:[#allocation2]]  ;;  %v859_v0 = vld [vmem:[%s169_s24] sm:$0x3]  ;;  %v861_v1 = vld [vmem:[%s169_s24 + $0x2] sm:$0x3] }
  0x51   : > { %s438_s28 = sld [smem:[#allocation2 + $0x1]]  ;;  %s439_s3 = sld [smem:[#allocation2 + $0x2]]  ;;  %v863_v2 = vld [vmem:[%s169_s24 + $0x4] sm:$0x3] }
  0x52   : > { %s444_s5 = sld [smem:[#allocation2 + $0xa]]  ;;  %s445_s15 = sld [smem:[#allocation2 + $0x3]] }
  0x53   : > { %s446_s16 = sld [smem:[#allocation2 + $0x4]]  ;;  %s447_s17 = sld [smem:[#allocation2 + $0x5]] }
  0x54   : > { %s867_s19 = sld [smem:[#allocation2 + $0xc]]  ;;  %s870_s23 = sld [smem:[#allocation2 + $0xb]] }
  0x55   : > { %s454_s27 = sld [smem:[#allocation2 + $0x6]]  ;;  %s455_s29 = sld [smem:[#allocation2 + $0x7]] }
  0x56   : > { %v198_v3 = vstv %s197_s18  ;;  %v200_v4 = vstv %s437_s22  ;;  %s872_s30 = sld [smem:[#allocation2 + $0x8]]  ;;  %s878_s6 = sld [smem:[#allocation2 + $0x15]] }
  0x57   : > { %v199_v5 = vmul.f32 %v198_v3, %v859_v0  ;;  %v203_v6 = vstv %s438_s28  ;;  %v207_v7 = vstv %s439_s3  ;;  %s880_s8 = sld [smem:[#allocation2 + $0xd]]  ;;  %s884_s24 = sld [smem:[#allocation2 + $0xf]] }
  0x58   : > { %v204_v8 = vmul.f32 %v861_v1, %v203_v6  ;;  %v208_v10 = vmul.f32 %v863_v2, %v207_v7  ;;  %v237_v12 = vstv %s445_s15  ;;  %v239_v13 = vstv %s444_s5  ;;  %s888_s22 = sld [smem:[#allocation2 + $0xe]]  ;;  %s896_s28 = sld [smem:[#allocation2 + $0x10]] }
  0x59   : > { %v201_v9 = vadd.f32 %v200_v4, %v199_v5  ;;  %v238_v14 = vmul.f32 %v237_v12, %v859_v0  ;;  %v242_v15 = vstv %s446_s16  ;;  %v246_v16 = vstv %s447_s17  ;;  %s894_s18 = sld [smem:[#allocation2 + $0x16]]  ;;  %s458_s3 = sld [smem:[#allocation2 + $0x12]] }
  0x5a   : > { %v243_v18 = vmul.f32 %v861_v1, %v242_v15  ;;  %v247_v20 = vmul.f32 %v863_v2, %v246_v16  ;;  %v219_v25 = vstv %s867_s19  ;;  %v279_v26 = vstv %s870_s23  ;;  %s451_s5 = sld [smem:[#allocation2 + $0x11]]  ;;  %s457_s15 = sld [smem:[#allocation2 + $0x17]] }
  0x5b   : > { %v205_v11 = vadd.f32 %v204_v8, %v201_v9  ;;  %v240_v19 = vadd.f32 %v239_v13, %v238_v14  ;;  %v277_v23 = vstv %s454_s27  ;;  %v282_v29 = vstv %s455_s29  ;;  %s459_s16 = sld [smem:[#allocation2 + $0x13]]  ;;  %s460_s17 = sld [smem:[#allocation2 + $0x14]] }
  0x5c   : > { %v278_v28 = vmul.f32 %v277_v23, %v859_v0  ;;  %v286_v30 = vstv %s872_s30  ;;  %v283_v31 = vmul.f32 %v861_v1, %v282_v29  ;;  %v220_v35 = vmul.f32 %v219_v25, %v859_v0  ;;  %s190_s19 = scalar_lea.vmem [#allocation7], %s467_s7  ;;  %s468_s27 = smul.u32 96, %s679_s12 }
  0x5d   : > { %v875_v17 = vadd.f32 %v208_v10, %v205_v11  ;;  %v244_v22 = vadd.f32 %v243_v18, %v240_v19  ;;  %v287_v34 = vmul.f32 %v863_v2, %v286_v30  ;;  %v221_v36 = vstv %s878_s6  ;;  %s330_s23 = sshll.u32 %s190_s19, 4  ;;  %s316_s6 = scalar_lea.sflag [#allocation4], %s849_s26  ;;  %s921_s23 = int_to_ptr.vmem [resolvable:$true] %s330_s23 }
  0x5e   : > { %v280_v33 = vadd.f32 %v279_v26, %v278_v28  ;;  %v224_v37 = vstv %s880_s8  ;;  %v258_v40 = vstv %s884_s24  ;;  %v222_v42 = vadd.f32 %v221_v36, %v220_v35  ;;  %s926_s30 = scalar_lea.hbm %s977_s2, %s468_s27  ;;  %s601_s8 = scalar_lea.vmem %s921_s23, 96 }
  0x5f   : > { %v210_v21 = vsub.f32 0.0, %v875_v17  ;;  %v890_v27 = vadd.f32 %v247_v20, %v244_v22  ;;  %v225_v43 = vmul.f32 %v861_v1, %v224_v37  ;;  %v228_v44 = vstv %s888_s22  ;;  %p602_p8 = scmp.ne.s32.totalorder %s921_s23, %s601_s8  ;;  %p990_p13 = scmp.ne.s32.totalorder %s984_s20, 0 }
  0x60   : > { %v284_v39 = vadd.f32 %v283_v31, %v280_v33  ;;  %v259_v45 = vmul.f32 %v258_v40, %v859_v0  ;;  %v260_v47 = vstv %s894_s18  ;;  %v263_v48 = vstv %s896_s28  ;;  %s693_s12 = smov [#allocation7]  }
  0x61   : > { %v211_v24 = vmul.f32 1.442695, %v210_v21  ;;  %v249_v32 = vsub.f32 0.0, %v890_v27  ;;  %v226_v51 = vadd.f32 %v225_v43, %v222_v42  ;;  %v229_v52 = vmul.f32 %v863_v2, %v228_v44  ;;  %p603_p0 = pnand %p602_p8, %p990_p13  ;;  %s605_s24 = sshll.u32 %s693_s12, 4  ;;  %s606_s24 = int_to_ptr.vmem [resolvable:$false] %s605_s24 }
  0x62   : > { %v288_v41 = vadd.f32 %v287_v34, %v284_v39  ;;  %v298_v53 = vstv %s458_s3  ;;  %v261_v55 = vadd.f32 %v260_v47, %v259_v45  ;;  %v264_v56 = vmul.f32 %v861_v1, %v263_v48  ;;  %s607_s22 = scalar_lea.vmem %s606_s24, 192  ;;  %p608_p6 = scmp.lt.s32.totalorder %s921_s23, %s606_s24 }
  0x63   : > { %546 = vpow2.f32 %v211_v24  ;;  %v250_v38 = vmul.f32 1.442695, %v249_v32  ;;  %v267_v57 = vstv %s451_s5  ;;  %v299_v58 = vmul.f32 %v298_v53, %v859_v0  ;;  %p604_p2 = pneg %p603_p0  ;;  %p609_p1 = scmp.lt.s32.totalorder %s607_s22, %s601_s8 }
  0x64   : > { %v289_v46 = vsub.f32 0.0, %v288_v41  ;;  %v230_v59 = vadd.f32 %v229_v52, %v226_v51  ;;  %v300_v60 = vstv %s457_s15  ;;  %v303_v61 = vstv %s459_s16 }
  0x65   : > { %548 = vpow2.f32 %v250_v38  ;;  %v265_v63 = vadd.f32 %v264_v56, %v261_v55  ;;  %v268_v3 = vmul.f32 %v863_v2, %v267_v57  ;;  %v301_v5 = vadd.f32 %v300_v60, %v299_v58  ;;  %p610_p7 = por %p609_p1, %p608_p6 }
  0x66   : > { %v290_v49 = vmul.f32 1.442695, %v289_v46  ;;  %v304_v6 = vmul.f32 %v861_v1, %v303_v61  ;;  %v231_v7 = vmax.f32 %v230_v59, 0.0  ;;  %v307_v8 = vstv %s460_s17 }
  0x67   : > { %v269_v9 = vadd.f32 %v268_v3, %v265_v63  ;;  %v308_v0 = vmul.f32 %v863_v2, %v307_v8  ;;  %p611_p12 = pnand %p610_p7, %p604_p2 }
  0x68   : > { %550 = vpow2.f32 %v290_v49  ;;  %v305_v11 = vadd.f32 %v304_v6, %v301_v5  ;;  %v232_v12 = vmin.f32 %v231_v7, 256.0 }
  0x69   : > { %v270_v15 = vmax.f32 %v269_v9, 0.0 }
  0x6a   : > { %v309_v18 = vadd.f32 %v308_v0, %v305_v11 }
  0x6b   : > { %v271_v1 = vmin.f32 %v270_v15, 256.0 }
  0x6c   : > { %v310_v2 = vmax.f32 %v309_v18, 0.0 }
  0x6d   : > { %v547_v50 = vpop.eup %546 }
  0x6e   : > { %v213_v54 = vadd.f32 1.0, %v547_v50  ;;  %v311_v23 = vmin.f32 %v310_v2, 256.0 }
  0x6f   : > { %v549_v62 = vpop.eup %548 }
  0x70   : > { %552 = vrcp.f32 %v213_v54  ;;  %v252_v4 = vadd.f32 1.0, %v549_v62 }
  0x72   : > { %554 = vrcp.f32 %v252_v4  ;;  %v551_v10 = vpop.eup %550 }
  0x73   : > { %v292_v13 = vadd.f32 1.0, %v551_v10 }
  0x75   : > { %556 = vrcp.f32 %v292_v13 }
  0x7a   : > { %v553_v14 = vpop.eup %552 }
  0x7b   : > { %v216_v16 = vmul.f32 %v553_v14, %v875_v17 }
  0x7c   : > { %v555_v20 = vpop.eup %554 }
  0x7d   : > { %v233_v19 = vmul.f32 %v232_v12, %v216_v16  ;;  %v255_v21 = vmul.f32 %v555_v20, %v890_v27 }
  0x7f   : > { %234 = vst [vmem:[%s190_s19] sm:$0x3] %v233_v19  ;;  %v272_v22 = vmul.f32 %v271_v1, %v255_v21  ;;  %v557_v24 = vpop.eup %556 }
  0x80   : > { %v295_v17 = vmul.f32 %v557_v24, %v288_v41 }
  0x81   : > { %452 = vst [vmem:[%s190_s19 + $0x2] sm:$0x3] %v272_v22 }
  0x82   : > { %v312_v25 = vmul.f32 %v311_v23, %v295_v17 }
  0x84   : > { %461 = vst [vmem:[%s190_s19 + $0x4] sm:$0x3] %v312_v25 }
  0x85   : > { %614 = shalt.err (!%p611_p12)
}
  0x86   : > { %s615_s18 = scalar_lea.hbm %s926_s30, 96  ;;  %s619_s5 = scalar_lea.hbm %s977_s2, 192 }
  0x87   : > { %p616_p4 = scmp.ne.s32.totalorder %s926_s30, %s615_s18  ;;  %p620_p5 = scmp.lt.u32.totalorder %s926_s30, %s977_s2 }
  0x88   : > { %p621_p9 = scmp.lt.u32.totalorder %s619_s5, %s615_s18  ;;  %p623_p8 = scmp.lt.u32.totalorder %s615_s18, %s926_s30 }
  0x89   : > { %p617_p10 = pnand %p616_p4, %p990_p13 }
  0x8a   : > { %p622_p3 = por %p621_p9, %p620_p5 }
  0x8b   : > { %p618_p11 = pneg %p617_p10 }
  0x8c   : > { %p624_p0 = por %p623_p8, %p622_p3 }
  0x8e   : > { %p625_p2 = pnand %p624_p0, %p618_p11 }
  0x90   : > { %628 = shalt.err (!%p625_p2)
}
  0x91   : > { %s694_s17 = smov 32   ;;  %s695_s19 = smov 2  }
  0x92   : > { %475 = dma.vmem_to_hbm [thread:$0]  (%p990_p13), %s921_s23, 96, %s926_s30, %s316_s6, %s694_s17, %s694_s17, %s695_s19  }
  0x93 PF: > { %s345_s27 = sand.u32 1, %s667_s9   ;;  %p991_p6 = scmp.ne.s32.totalorder %s985_s21, 0 }
  0x94   : > { %p992_p1 = scmp.ge.s32.totalorder %s687_s14, 2  ;;  %s346_s29 = scalar_lea.sflag [#allocation4], %s345_s27 }
  0x96   : > { %p486_p7 = pnand %p992_p1, %p991_p6 }
  0x98   : > { %662 = dma.done.wait (!%p486_p7), %s346_s29, 96  }
  0x99   : > { %664 = vsyncadd (!%p486_p7), %s346_s29, 4294967200  ;;  %s19_s14 = sadd.s32 1, %s687_s14   ;;  %s993_s9 = smov %s671_s10 }
  0x9a   : > { %p16_p12 = scmp.ge.s32.totalorder %s19_s14, 4   ;;  %s994_s10 = smov %s675_s11 }
  0x9b   : > { %s995_s11 = smov %s812_s4  ;;  %s996_s12 = smov %s683_s13 }
  0x9c   : > { %s997_s13 = smov %s999_s25  ;;  %18 = sbr.rel (!%p16_p12) target bundleno = 7 (0x7), region = 82 }
  0xa3   :  { %351 = vsyncpa [#allocation3], 1 }
  0xa4   :  { %353 = vsyncpa [#allocation3 + $0x1], 1 }
  0xa5   :  { %354 = vsyncpa [#allocation4], 1 }
  0xa6   :  { %356 = vsyncpa [#allocation4 + $0x1], 1 }
  0xa7   :  { %357 = vsyncpa [#allocation5], 1 }
  0xa8   :  { %359 = vsyncpa [#allocation5 + $0x1], 1 }

</bundles_post_ra>
